<compile_context>
chip_gen: v6e
topology: v6e:2x2x1
jax: 0.10.0
libtpu: 0.0.40
codegen_flags: <defaults>
</compile_context>

<pallas_src>
import functools

import jax
import jax.numpy as jnp
from jax import lax
from jax.experimental import pallas as pl
from jax.experimental.pallas import tpu as pltpu

_SUBLANE = 8
_TARGET_BLOCK_BYTES = 4 << 20       # ~4 MiB blocks ~= 86% HBM roofline plateau
_VMEM_LIMIT_BYTES = 48 * 1024 * 1024  # safe on v7x (64 MiB physical VMEM)


def _round_down(v, m):
    return (v // m) * m


def _largest_divisor_leq(n, cap):
    cap = max(1, min(n, cap))
    for d in range(cap, 0, -1):
        if n % d == 0:
            return d
    return 1


def _choose_tiling(B, T, F, itemsize, target_bytes):
    """Returns (bt, tile_t): batch rows per block and time rows per block."""
    slab_bytes = T * F * itemsize          # one full batch row
    if slab_bytes >= target_bytes:
        # One batch row per block; tile the time axis (multiple of 8 rows so
        # the second-last block dim satisfies the sublane constraint; the
        # last block may be partial -> Pallas masks the writeback).
        rows = max(_SUBLANE, target_bytes // (F * itemsize))
        tile_t = _round_down(rows, _SUBLANE)
        if tile_t >= T:
            tile_t = T                     # full dim is always legal
        return 1, tile_t
    # Pack several full batch rows per block (full T and full F per row).
    bt_cap = max(1, target_bytes // slab_bytes)
    # Keep >= ~4 grid steps so v7x's two TensorCores both get work.
    bt_cap = min(bt_cap, max(1, B // min(B, 4)))
    bt = _largest_divisor_leq(B, bt_cap)   # exact divisor: no partial batch block
    return bt, T


# ----------------------------------------------------------------------------
# Pallas kernel: mask one (bt, tile_t, F) slab of the spectrogram.
# ----------------------------------------------------------------------------
def _spec_mask_kernel(ts_ref, tw_ref, fs_ref, fw_ref, x_ref, o_ref, *,
                      n_time_masks, n_freq_masks, fill_value):
    bt, tile_t, F = x_ref.shape
    t_off = pl.program_id(1) * tile_t

    # Tiny 1-D index vectors (never a full (T, F) iota).
    t_idx = lax.broadcasted_iota(jnp.int32, (tile_t, 1), 0) + t_off   # global t
    f_idx = lax.broadcasted_iota(jnp.int32, (1, F), 1)
    fill = jnp.asarray(fill_value, dtype=o_ref.dtype)

    for bb in range(bt):                       # static unroll over packed rows
        b = pl.program_id(0) * bt + bb         # global batch index

        # Time masks (dim = -2): accumulate on a (tile_t, 1) column.
        tmask = jnp.zeros((tile_t, 1), dtype=jnp.bool_)
        for j in range(n_time_masks):
            s = ts_ref[b * n_time_masks + j]
            w = tw_ref[b * n_time_masks + j]   # w == 0 => no-op mask
            tmask = jnp.logical_or(
                tmask, jnp.logical_and(t_idx >= s, t_idx < s + w))

        # Freq masks (dim = -1): accumulate on a (1, F) row.
        fmask = jnp.zeros((1, F), dtype=jnp.bool_)
        for j in range(n_freq_masks):
            s = fs_ref[b * n_freq_masks + j]
            w = fw_ref[b * n_freq_masks + j]
            fmask = jnp.logical_or(
                fmask, jnp.logical_and(f_idx >= s, f_idx < s + w))

        mask = jnp.logical_or(tmask, fmask)    # broadcast to (tile_t, F)
        o_ref[bb] = jnp.where(mask, fill, x_ref[bb])


def spec_augment_pallas(x, time_starts, time_widths, freq_starts, freq_widths,
                        *, fill_value, target_block_bytes=_TARGET_BLOCK_BYTES):
    """x: (B, T, F). Scalar-prefetch args are flat int32 arrays of shape (B*n,)."""
    B, T, F = x.shape
    nt = time_starts.shape[0] // B
    nf = freq_starts.shape[0] // B
    itemsize = jnp.dtype(x.dtype).itemsize

    bt, tile_t = _choose_tiling(B, T, F, itemsize, target_block_bytes)
    grid = (B // bt, pl.cdiv(T, tile_t))

    kernel = functools.partial(
        _spec_mask_kernel,
        n_time_masks=nt, n_freq_masks=nf, fill_value=fill_value)

    return pl.pallas_call(
        kernel,
        out_shape=jax.ShapeDtypeStruct((B, T, F), x.dtype),
        grid_spec=pltpu.PrefetchScalarGridSpec(
            num_scalar_prefetch=4,
            grid=grid,
            in_specs=[pl.BlockSpec((bt, tile_t, F),
                                   lambda b, t, *_: (b, t, 0))],
            out_specs=pl.BlockSpec((bt, tile_t, F),
                                   lambda b, t, *_: (b, t, 0)),
        ),
        # x is operand 4 (after the 4 scalar-prefetch tables); in-place when
        # the caller donates x, otherwise XLA inserts one defensive copy.
        input_output_aliases={4: 0},
        compiler_params=pltpu.CompilerParams(
            dimension_semantics=("parallel", "parallel"),
            vmem_limit_bytes=_VMEM_LIMIT_BYTES),
    )(time_starts, time_widths, freq_starts, freq_widths, x)


# ----------------------------------------------------------------------------
# Glue: random mask-parameter generation (mirrors AxisMasker's randint logic).
# ----------------------------------------------------------------------------
def _axis_mask_params(key, batch, dim_len, min_w, max_w, min_n, max_n):
    """Returns (starts, widths) int32 arrays of shape (batch, max_n).

    num_masks is sampled once per call (scalar) like the PyTorch module; mask
    slots with index >= num_masks get width 0 (no-op).  max_start is the
    global max over (batch, masks), matching the reference's torch.max(widths).
    """
    max_n = max(max_n, 1)
    k_num, k_w, k_s = jax.random.split(key, 3)
    num_masks = jax.random.randint(k_num, (), min_n, max_n + 1)
    widths = jax.random.randint(k_w, (batch, max_n), min_w, max_w + 1)
    active = jnp.arange(max_n)[None, :] < num_masks
    widths = jnp.where(active, widths, 0).astype(jnp.int32)
    max_start = jnp.maximum(dim_len - jnp.max(widths) + 1, 1)
    starts = jax.random.randint(k_s, (batch, max_n), 0, max_start).astype(jnp.int32)
    return starts, widths


class SpecAugmentJax:
    """JAX/Pallas port of hyperion SpecAugment (masking path)."""

    def __init__(self,
                 time_warp_prob=0.0, time_warp_window=5, time_warp_mode="bicubic",
                 time_mask_prob=0.0, time_mask_min_width=0, time_mask_max_width=100,
                 time_mask_min_num_masks=1, time_mask_max_num_masks=2,
                 freq_mask_prob=0.0, freq_mask_min_width=0, freq_mask_max_width=20,
                 freq_mask_min_num_masks=1, freq_mask_max_num_masks=2,
                 fill_value=0.0):
        self.time_warp_prob = time_warp_prob
        self.time_mask_prob = time_mask_prob
        self.time_mask_min_width = time_mask_min_width
        self.time_mask_max_width = time_mask_max_width
        self.time_mask_min_num_masks = time_mask_min_num_masks
        self.time_mask_max_num_masks = time_mask_max_num_masks
        self.freq_mask_prob = freq_mask_prob
        self.freq_mask_min_width = freq_mask_min_width
        self.freq_mask_max_width = freq_mask_max_width
        self.freq_mask_min_num_masks = freq_mask_min_num_masks
        self.freq_mask_max_num_masks = freq_mask_max_num_masks
        self.fill_value = fill_value
        # TODO(synk): time warping (SpecWarper / bicubic interpolate) not
        # implemented; no clean Pallas equivalent and default prob is 0.

    def __call__(self, key, x, training=True):
        if not training:
            return x
        B, T, F = x.shape
        k_r, k_t, k_f = jax.random.split(key, 3)
        r = jax.random.uniform(k_r, (3,))  # r[0] would gate time-warp

        nt = max(self.time_mask_max_num_masks, 1)
        nf = max(self.freq_mask_max_num_masks, 1)

        if self.time_mask_prob > 0:
            t_starts, t_widths = _axis_mask_params(
                k_t, B, T,
                self.time_mask_min_width, self.time_mask_max_width,
                self.time_mask_min_num_masks, self.time_mask_max_num_masks)
            # Fold the probability gate into the widths (width 0 => no-op).
            time_flag = (self.time_mask_prob > r[1]).astype(jnp.int32)
            t_widths = t_widths * time_flag
        else:
            t_starts = jnp.zeros((B, nt), jnp.int32)
            t_widths = jnp.zeros((B, nt), jnp.int32)

        if self.freq_mask_prob > 0:
            f_starts, f_widths = _axis_mask_params(
                k_f, B, F,
                self.freq_mask_min_width, self.freq_mask_max_width,
                self.freq_mask_min_num_masks, self.freq_mask_max_num_masks)
            freq_flag = (self.freq_mask_prob > r[2]).astype(jnp.int32)
            f_widths = f_widths * freq_flag
        else:
            f_starts = jnp.zeros((B, nf), jnp.int32)
            f_widths = jnp.zeros((B, nf), jnp.int32)

        # Flatten to 1-D to keep SMEM padding tiny.
        return spec_augment_pallas(
            x,
            t_starts.reshape(-1), t_widths.reshape(-1),
            f_starts.reshape(-1), f_widths.reshape(-1),
            fill_value=self.fill_value)


# ----------------------------------------------------------------------------
# Pure-JAX reference for the masking path (deterministic tables).
# ----------------------------------------------------------------------------
def _reference_mask(x, ts, tw, fs, fw, fill):
    B, T, F = x.shape
    nt = ts.shape[0] // B
    nf = fs.shape[0] // B
    ts = ts.reshape(B, nt); tw = tw.reshape(B, nt)
    fs = fs.reshape(B, nf); fw = fw.reshape(B, nf)
    t = jnp.arange(T)[None, :, None]
    f = jnp.arange(F)[None, :, None]
    tmask = jnp.any((ts[:, None, :] <= t) & (t < (ts + tw)[:, None, :]), axis=-1)  # (B,T)
    fmask = jnp.any((fs[:, None, :] <= f) & (f < (fs + fw)[:, None, :]), axis=-1)  # (B,F)
    mask = tmask[:, :, None] | fmask[:, None, :]
    return jnp.where(mask, jnp.asarray(fill, x.dtype), x)


if __name__ == "__main__":
    key = jax.random.PRNGKey(0)
    k_x, k_aug, k_det = jax.random.split(key, 3)

    # ---- 1) Deterministic-table check (batch-packed path, bt=2) ----
    Bd, Td, Fd = 8, 50, 80
    x_det = jax.random.normal(k_det, (Bd, Td, Fd), dtype=jnp.float32)
    ts = jnp.tile(jnp.array([3, 20], jnp.int32), (Bd, 1)) + jnp.arange(Bd, dtype=jnp.int32)[:, None]
    tw = jnp.tile(jnp.array([5, 4], jnp.int32), (Bd, 1))
    fs = jnp.tile(jnp.array([0, 60], jnp.int32), (Bd, 1)) + 2 * jnp.arange(Bd, dtype=jnp.int32)[:, None]
    fw = jnp.tile(jnp.array([3, 10], jnp.int32), (Bd, 1))
    y_det = spec_augment_pallas(
        x_det, ts.reshape(-1), tw.reshape(-1), fs.reshape(-1), fw.reshape(-1),
        fill_value=0.0)
    y_det = jax.block_until_ready(y_det)
    ref = _reference_mask(x_det, ts.reshape(-1), tw.reshape(-1),
                          fs.reshape(-1), fw.reshape(-1), 0.0)
    assert bool(jnp.array_equal(y_det, ref))

    # ---- 2) Same tables, but force the time-tiled / partial-last-block path ----
    y_tile = spec_augment_pallas(
        x_det, ts.reshape(-1), tw.reshape(-1), fs.reshape(-1), fw.reshape(-1),
        fill_value=0.0, target_block_bytes=4096)
    y_tile = jax.block_until_ready(y_tile)
    assert bool(jnp.array_equal(y_tile, ref))

    # ---- 3) Full SpecAugment smoke test (random masks via the class) ----
    B, T, F = 4, 50, 80
    x = jax.random.normal(k_x, (B, T, F), dtype=jnp.float32)
    x_zero_count = int(jnp.sum(x == 0.0))

    aug = SpecAugmentJax(
        time_mask_prob=1.0, time_mask_min_width=1, time_mask_max_width=8,
        time_mask_min_num_masks=1, time_mask_max_num_masks=2,
        freq_mask_prob=1.0, freq_mask_min_width=1, freq_mask_max_width=16,
        freq_mask_min_num_masks=1, freq_mask_max_num_masks=2,
        fill_value=0.0)

    y = aug(k_aug, x, training=True)
    y = jax.block_until_ready(y)

    # sanity: shape/dtype preserved; every element is either the fill value or
    # the original input; at least one bin got masked.
    assert y.shape == x.shape and y.dtype == x.dtype
    assert bool(jnp.all(jnp.logical_or(y == 0.0, y == x)))
    assert int(jnp.sum(y == 0.0)) > x_zero_count
    print("KERNEL_OK")
</pallas_src>

<mosaic_0001>
module attributes {stable_mosaic.version = 11 : i64} {
  func.func @_spec_mask_kernel(%arg0: i32, %arg1: i32, %arg2: memref<16xi32, #tpu.memory_space<smem>>, %arg3: memref<16xi32, #tpu.memory_space<smem>>, %arg4: memref<16xi32, #tpu.memory_space<smem>>, %arg5: memref<16xi32, #tpu.memory_space<smem>>, %arg6: memref<2x50x80xf32, #tpu.memory_space<vmem>>, %arg7: memref<2x50x80xf32, #tpu.memory_space<vmem>>) attributes {dimension_semantics = [#tpu.dimension_semantics<parallel>, #tpu.dimension_semantics<parallel>], iteration_bounds = array<i64: 4, 1>, scalar_prefetch = 4 : i64, scratch_operands = 0 : i64, tpu.core_type = #tpu.core_type<tc>, window_params = [{transform_indices = @transform_0, window_bounds = array<i64: 2, 50, 80>}, {transform_indices = @transform_1, window_bounds = array<i64: 2, 50, 80>}]} {
    %c50_i32 = arith.constant 50 : i32
    %0 = arith.muli %arg1, %c50_i32 : i32
    %1 = tpu.iota {dimensions = array<i32: 0>} : vector<50x1xi32>
    %2 = vector.broadcast %0 : i32 to vector<50x1xi32>
    %3 = arith.addi %1, %2 : vector<50x1xi32>
    %4 = tpu.iota {dimensions = array<i32: 1>} : vector<1x80xi32>
    %c2_i32 = arith.constant 2 : i32
    %5 = arith.muli %arg0, %c2_i32 : i32
    %c0_i32 = arith.constant 0 : i32
    %6 = arith.addi %5, %c0_i32 : i32
    %false = arith.constant false
    %7 = vector.broadcast %false : i1 to vector<50x1xi1>
    %c2_i32_0 = arith.constant 2 : i32
    %8 = arith.muli %6, %c2_i32_0 : i32
    %c0_i32_1 = arith.constant 0 : i32
    %9 = arith.addi %8, %c0_i32_1 : i32
    %10 = arith.index_cast %9 : i32 to index
    %11 = memref.load %arg2[%10] : memref<16xi32, #tpu.memory_space<smem>>
    %c2_i32_2 = arith.constant 2 : i32
    %12 = arith.muli %6, %c2_i32_2 : i32
    %c0_i32_3 = arith.constant 0 : i32
    %13 = arith.addi %12, %c0_i32_3 : i32
    %14 = arith.index_cast %13 : i32 to index
    %15 = memref.load %arg3[%14] : memref<16xi32, #tpu.memory_space<smem>>
    %16 = vector.broadcast %11 : i32 to vector<50x1xi32>
    %17 = arith.cmpi sge, %3, %16 : vector<50x1xi32>
    %18 = arith.addi %11, %15 : i32
    %19 = vector.broadcast %18 : i32 to vector<50x1xi32>
    %20 = arith.cmpi slt, %3, %19 : vector<50x1xi32>
    %21 = arith.andi %17, %20 : vector<50x1xi1>
    %22 = arith.ori %7, %21 : vector<50x1xi1>
    %c2_i32_4 = arith.constant 2 : i32
    %23 = arith.muli %6, %c2_i32_4 : i32
    %c1_i32 = arith.constant 1 : i32
    %24 = arith.addi %23, %c1_i32 : i32
    %25 = arith.index_cast %24 : i32 to index
    %26 = memref.load %arg2[%25] : memref<16xi32, #tpu.memory_space<smem>>
    %c2_i32_5 = arith.constant 2 : i32
    %27 = arith.muli %6, %c2_i32_5 : i32
    %c1_i32_6 = arith.constant 1 : i32
    %28 = arith.addi %27, %c1_i32_6 : i32
    %29 = arith.index_cast %28 : i32 to index
    %30 = memref.load %arg3[%29] : memref<16xi32, #tpu.memory_space<smem>>
    %31 = vector.broadcast %26 : i32 to vector<50x1xi32>
    %32 = arith.cmpi sge, %3, %31 : vector<50x1xi32>
    %33 = arith.addi %26, %30 : i32
    %34 = vector.broadcast %33 : i32 to vector<50x1xi32>
    %35 = arith.cmpi slt, %3, %34 : vector<50x1xi32>
    %36 = arith.andi %32, %35 : vector<50x1xi1>
    %37 = arith.ori %22, %36 : vector<50x1xi1>
    %false_7 = arith.constant false
    %38 = vector.broadcast %false_7 : i1 to vector<1x80xi1>
    %c2_i32_8 = arith.constant 2 : i32
    %39 = arith.muli %6, %c2_i32_8 : i32
    %c0_i32_9 = arith.constant 0 : i32
    %40 = arith.addi %39, %c0_i32_9 : i32
    %41 = arith.index_cast %40 : i32 to index
    %42 = memref.load %arg4[%41] : memref<16xi32, #tpu.memory_space<smem>>
    %c2_i32_10 = arith.constant 2 : i32
    %43 = arith.muli %6, %c2_i32_10 : i32
    %c0_i32_11 = arith.constant 0 : i32
    %44 = arith.addi %43, %c0_i32_11 : i32
    %45 = arith.index_cast %44 : i32 to index
    %46 = memref.load %arg5[%45] : memref<16xi32, #tpu.memory_space<smem>>
    %47 = vector.broadcast %42 : i32 to vector<1x80xi32>
    %48 = arith.cmpi sge, %4, %47 : vector<1x80xi32>
    %49 = arith.addi %42, %46 : i32
    %50 = vector.broadcast %49 : i32 to vector<1x80xi32>
    %51 = arith.cmpi slt, %4, %50 : vector<1x80xi32>
    %52 = arith.andi %48, %51 : vector<1x80xi1>
    %53 = arith.ori %38, %52 : vector<1x80xi1>
    %c2_i32_12 = arith.constant 2 : i32
    %54 = arith.muli %6, %c2_i32_12 : i32
    %c1_i32_13 = arith.constant 1 : i32
    %55 = arith.addi %54, %c1_i32_13 : i32
    %56 = arith.index_cast %55 : i32 to index
    %57 = memref.load %arg4[%56] : memref<16xi32, #tpu.memory_space<smem>>
    %c2_i32_14 = arith.constant 2 : i32
    %58 = arith.muli %6, %c2_i32_14 : i32
    %c1_i32_15 = arith.constant 1 : i32
    %59 = arith.addi %58, %c1_i32_15 : i32
    %60 = arith.index_cast %59 : i32 to index
    %61 = memref.load %arg5[%60] : memref<16xi32, #tpu.memory_space<smem>>
    %62 = vector.broadcast %57 : i32 to vector<1x80xi32>
    %63 = arith.cmpi sge, %4, %62 : vector<1x80xi32>
    %64 = arith.addi %57, %61 : i32
    %65 = vector.broadcast %64 : i32 to vector<1x80xi32>
    %66 = arith.cmpi slt, %4, %65 : vector<1x80xi32>
    %67 = arith.andi %63, %66 : vector<1x80xi1>
    %68 = arith.ori %53, %67 : vector<1x80xi1>
    %69 = vector.broadcast %37 : vector<50x1xi1> to vector<50x80xi1>
    %70 = vector.broadcast %68 : vector<1x80xi1> to vector<50x80xi1>
    %71 = arith.ori %69, %70 : vector<50x80xi1>
    %c0 = arith.constant 0 : index
    %c0_16 = arith.constant 0 : index
    %c0_17 = arith.constant 0 : index
    %72 = vector.load %arg6[%c0, %c0_16, %c0_17] : memref<2x50x80xf32, #tpu.memory_space<vmem>>, vector<1x50x80xf32>
    %73 = vector.shape_cast %72 : vector<1x50x80xf32> to vector<50x80xf32>
    %cst = arith.constant 0.000000e+00 : f32
    %74 = vector.broadcast %cst : f32 to vector<50x80xf32>
    %75 = arith.select %71, %74, %73 : vector<50x80xi1>, vector<50x80xf32>
    %c0_18 = arith.constant 0 : index
    %c0_19 = arith.constant 0 : index
    %c0_20 = arith.constant 0 : index
    %76 = vector.load %arg7[%c0_18, %c0_19, %c0_20] : memref<2x50x80xf32, #tpu.memory_space<vmem>>, vector<1x50x80xf32>
    %77 = vector.shape_cast %76 : vector<1x50x80xf32> to vector<50x80xf32>
    %78 = vector.shape_cast %75 : vector<50x80xf32> to vector<1x50x80xf32>
    tpu.vector_store %arg7[%c0_18, %c0_19, %c0_20], %78 {strides = array<i32>} : memref<2x50x80xf32, #tpu.memory_space<vmem>>, vector<1x50x80xf32>,
    %c2_i32_21 = arith.constant 2 : i32
    %79 = arith.muli %arg0, %c2_i32_21 : i32
    %c1_i32_22 = arith.constant 1 : i32
    %80 = arith.addi %79, %c1_i32_22 : i32
    %false_23 = arith.constant false
    %81 = vector.broadcast %false_23 : i1 to vector<50x1xi1>
    %c2_i32_24 = arith.constant 2 : i32
    %82 = arith.muli %80, %c2_i32_24 : i32
    %c0_i32_25 = arith.constant 0 : i32
    %83 = arith.addi %82, %c0_i32_25 : i32
    %84 = arith.index_cast %83 : i32 to index
    %85 = memref.load %arg2[%84] : memref<16xi32, #tpu.memory_space<smem>>
    %c2_i32_26 = arith.constant 2 : i32
    %86 = arith.muli %80, %c2_i32_26 : i32
    %c0_i32_27 = arith.constant 0 : i32
    %87 = arith.addi %86, %c0_i32_27 : i32
    %88 = arith.index_cast %87 : i32 to index
    %89 = memref.load %arg3[%88] : memref<16xi32, #tpu.memory_space<smem>>
    %90 = vector.broadcast %85 : i32 to vector<50x1xi32>
    %91 = arith.cmpi sge, %3, %90 : vector<50x1xi32>
    %92 = arith.addi %85, %89 : i32
    %93 = vector.broadcast %92 : i32 to vector<50x1xi32>
    %94 = arith.cmpi slt, %3, %93 : vector<50x1xi32>
    %95 = arith.andi %91, %94 : vector<50x1xi1>
    %96 = arith.ori %81, %95 : vector<50x1xi1>
    %c2_i32_28 = arith.constant 2 : i32
    %97 = arith.muli %80, %c2_i32_28 : i32
    %c1_i32_29 = arith.constant 1 : i32
    %98 = arith.addi %97, %c1_i32_29 : i32
    %99 = arith.index_cast %98 : i32 to index
    %100 = memref.load %arg2[%99] : memref<16xi32, #tpu.memory_space<smem>>
    %c2_i32_30 = arith.constant 2 : i32
    %101 = arith.muli %80, %c2_i32_30 : i32
    %c1_i32_31 = arith.constant 1 : i32
    %102 = arith.addi %101, %c1_i32_31 : i32
    %103 = arith.index_cast %102 : i32 to index
    %104 = memref.load %arg3[%103] : memref<16xi32, #tpu.memory_space<smem>>
    %105 = vector.broadcast %100 : i32 to vector<50x1xi32>
    %106 = arith.cmpi sge, %3, %105 : vector<50x1xi32>
    %107 = arith.addi %100, %104 : i32
    %108 = vector.broadcast %107 : i32 to vector<50x1xi32>
    %109 = arith.cmpi slt, %3, %108 : vector<50x1xi32>
    %110 = arith.andi %106, %109 : vector<50x1xi1>
    %111 = arith.ori %96, %110 : vector<50x1xi1>
    %false_32 = arith.constant false
    %112 = vector.broadcast %false_32 : i1 to vector<1x80xi1>
    %c2_i32_33 = arith.constant 2 : i32
    %113 = arith.muli %80, %c2_i32_33 : i32
    %c0_i32_34 = arith.constant 0 : i32
    %114 = arith.addi %113, %c0_i32_34 : i32
    %115 = arith.index_cast %114 : i32 to index
    %116 = memref.load %arg4[%115] : memref<16xi32, #tpu.memory_space<smem>>
    %c2_i32_35 = arith.constant 2 : i32
    %117 = arith.muli %80, %c2_i32_35 : i32
    %c0_i32_36 = arith.constant 0 : i32
    %118 = arith.addi %117, %c0_i32_36 : i32
    %119 = arith.index_cast %118 : i32 to index
    %120 = memref.load %arg5[%119] : memref<16xi32, #tpu.memory_space<smem>>
    %121 = vector.broadcast %116 : i32 to vector<1x80xi32>
    %122 = arith.cmpi sge, %4, %121 : vector<1x80xi32>
    %123 = arith.addi %116, %120 : i32
    %124 = vector.broadcast %123 : i32 to vector<1x80xi32>
    %125 = arith.cmpi slt, %4, %124 : vector<1x80xi32>
    %126 = arith.andi %122, %125 : vector<1x80xi1>
    %127 = arith.ori %112, %126 : vector<1x80xi1>
    %c2_i32_37 = arith.constant 2 : i32
    %128 = arith.muli %80, %c2_i32_37 : i32
    %c1_i32_38 = arith.constant 1 : i32
    %129 = arith.addi %128, %c1_i32_38 : i32
    %130 = arith.index_cast %129 : i32 to index
    %131 = memref.load %arg4[%130] : memref<16xi32, #tpu.memory_space<smem>>
    %c2_i32_39 = arith.constant 2 : i32
    %132 = arith.muli %80, %c2_i32_39 : i32
    %c1_i32_40 = arith.constant 1 : i32
    %133 = arith.addi %132, %c1_i32_40 : i32
    %134 = arith.index_cast %133 : i32 to index
    %135 = memref.load %arg5[%134] : memref<16xi32, #tpu.memory_space<smem>>
    %136 = vector.broadcast %131 : i32 to vector<1x80xi32>
    %137 = arith.cmpi sge, %4, %136 : vector<1x80xi32>
    %138 = arith.addi %131, %135 : i32
    %139 = vector.broadcast %138 : i32 to vector<1x80xi32>
    %140 = arith.cmpi slt, %4, %139 : vector<1x80xi32>
    %141 = arith.andi %137, %140 : vector<1x80xi1>
    %142 = arith.ori %127, %141 : vector<1x80xi1>
    %143 = vector.broadcast %111 : vector<50x1xi1> to vector<50x80xi1>
    %144 = vector.broadcast %142 : vector<1x80xi1> to vector<50x80xi1>
    %145 = arith.ori %143, %144 : vector<50x80xi1>
    %c1 = arith.constant 1 : index
    %c0_41 = arith.constant 0 : index
    %c0_42 = arith.constant 0 : index
    %146 = vector.load %arg6[%c1, %c0_41, %c0_42] : memref<2x50x80xf32, #tpu.memory_space<vmem>>, vector<1x50x80xf32>
    %147 = vector.shape_cast %146 : vector<1x50x80xf32> to vector<50x80xf32>
    %cst_43 = arith.constant 0.000000e+00 : f32
    %148 = vector.broadcast %cst_43 : f32 to vector<50x80xf32>
    %149 = arith.select %145, %148, %147 : vector<50x80xi1>, vector<50x80xf32>
    %c1_44 = arith.constant 1 : index
    %c0_45 = arith.constant 0 : index
    %c0_46 = arith.constant 0 : index
    %150 = vector.load %arg7[%c1_44, %c0_45, %c0_46] : memref<2x50x80xf32, #tpu.memory_space<vmem>>, vector<1x50x80xf32>
    %151 = vector.shape_cast %150 : vector<1x50x80xf32> to vector<50x80xf32>
    %152 = vector.shape_cast %149 : vector<50x80xf32> to vector<1x50x80xf32>
    tpu.vector_store %arg7[%c1_44, %c0_45, %c0_46], %152 {strides = array<i32>} : memref<2x50x80xf32, #tpu.memory_space<vmem>>, vector<1x50x80xf32>,
    return
  }
  func.func @transform_0(%arg0: i32, %arg1: i32, %arg2: memref<16xi32, #tpu.memory_space<smem>>, %arg3: memref<16xi32, #tpu.memory_space<smem>>, %arg4: memref<16xi32, #tpu.memory_space<smem>>, %arg5: memref<16xi32, #tpu.memory_space<smem>>) -> (i32, i32, i32) {
    %c0_i32 = arith.constant 0 : i32
    %c0_i32_0 = arith.constant 0 : i32
    return %arg0, %arg1, %c0_i32 : i32, i32, i32
  }
  func.func @transform_1(%arg0: i32, %arg1: i32, %arg2: memref<16xi32, #tpu.memory_space<smem>>, %arg3: memref<16xi32, #tpu.memory_space<smem>>, %arg4: memref<16xi32, #tpu.memory_space<smem>>, %arg5: memref<16xi32, #tpu.memory_space<smem>>) -> (i32, i32, i32) {
    %c0_i32 = arith.constant 0 : i32
    %c0_i32_0 = arith.constant 0 : i32
    return %arg0, %arg1, %c0_i32 : i32, i32, i32
  }
}

</mosaic_0001>

<bundles_post_ra>
// kernel: tpu_custom_call.1
= control target key start
LH: loop header
LB: loop body
LE: loop exit
PB: predicated region body
PF: predicated region fallthrough
CT: control target
= control target key end

     0   :  { %s1108_s0 = inlined_call_operand.vmem [shape: s32[16], index: 0, kind: input, shape index: {}]   ;;  %s1109_s4 = inlined_call_operand.vmem [shape: f32[8,50,80], index: 4, kind: input, shape index: {}, may-alias: {4,5}]   ;;  %s1110_s5 = inlined_call_operand.vmem [shape: f32[8,50,80], index: 5, kind: output, shape index: {}, may-alias: {4,5}]   ;;  %s1111_s1 = inlined_call_operand.vmem [shape: s32[16], index: 1, kind: input, shape index: {}]   ;;  %s1112_s2 = inlined_call_operand.vmem [shape: s32[16], index: 2, kind: input, shape index: {}]   ;;  %s1113_s3 = inlined_call_operand.vmem [shape: s32[16], index: 3, kind: input, shape index: {}]  }
   0x1   :  { %s10_s20 = sshll.u32 %s1108_s0, 4  ;;  %s14_s23 = sshll.u32 %s1111_s1, 4  ;;  %s11_s20 = int_to_ptr.vmem [resolvable:$true] %s10_s20  ;;  %s15_s23 = int_to_ptr.vmem [resolvable:$true] %s14_s23 }
   0x2   :  { %s605_s24 = scalar_lea.vmem %s11_s20, 16  ;;  %p610_p1 = scmp.lt.s32.totalorder %s11_s20, %s11_s20 }
   0x3   :  { %p606_p0 = scmp.ne.s32.totalorder %s11_s20, %s605_s24  ;;  %p611_p2 = scmp.lt.s32.totalorder %s605_s24, %s605_s24 }
   0x5   :  { %p612_p3 = por %p611_p2, %p610_p1 }
   0x7   :  { %p613_p4 = pnand %p612_p3, %p606_p0 }
   0x9   :  { %616 = shalt.err (!%p613_p4)  }
   0xa   :  { %s679_s25 = smov [#allocation3]   ;;  %s617_s26 = scalar_lea.vmem %s15_s23, 16 }
   0xb   :  { %13 = dma.vmem_to_smem %s11_s20, 16, %s679_s25, [#allocation2] }
   0xc   :  { %p618_p5 = scmp.ne.s32.totalorder %s15_s23, %s617_s26  ;;  %p622_p6 = scmp.lt.s32.totalorder %s15_s23, %s15_s23 }
   0xd   :  { %p623_p7 = scmp.lt.s32.totalorder %s617_s26, %s617_s26 }
   0xf   :  { %p624_p8 = por %p623_p7, %p622_p6 }
  0x11   :  { %p625_p9 = pnand %p624_p8, %p618_p5 }
  0x13   :  { %628 = shalt.err (!%p625_p9)  }
  0x14   :  { %s680_s0 = smov [#allocation4]   ;;  %s18_s28 = sshll.u32 %s1112_s2, 4  ;;  %s19_s28 = int_to_ptr.vmem [resolvable:$true] %s18_s28 }
  0x15   :  { %17 = dma.vmem_to_smem %s15_s23, 16, %s680_s0, [#allocation2] }
  0x16   :  { %s22_s6 = sshll.u32 %s1113_s3, 4  ;;  %s629_s7 = scalar_lea.vmem %s19_s28, 16  ;;  %s23_s6 = int_to_ptr.vmem [resolvable:$true] %s22_s6 }
  0x17   :  { %p630_p10 = scmp.ne.s32.totalorder %s19_s28, %s629_s7  ;;  %p634_p11 = scmp.lt.s32.totalorder %s19_s28, %s19_s28 }
  0x18   :  { %p635_p12 = scmp.lt.s32.totalorder %s629_s7, %s629_s7 }
  0x1a   :  { %p636_p13 = por %p635_p12, %p634_p11 }
  0x1c   :  { %p637_p0 = pnand %p636_p13, %p630_p10 }
  0x1e   :  { %640 = shalt.err (!%p637_p0)  }
  0x1f   :  { %s681_s8 = smov [#allocation5]   ;;  %s641_s9 = scalar_lea.vmem %s23_s6, 16 }
  0x20   :  { %21 = dma.vmem_to_smem %s19_s28, 16, %s681_s8, [#allocation2] }
  0x21   :  { %p642_p1 = scmp.ne.s32.totalorder %s23_s6, %s641_s9  ;;  %p646_p2 = scmp.lt.s32.totalorder %s23_s6, %s23_s6 }
  0x22   :  { %p647_p3 = scmp.lt.s32.totalorder %s641_s9, %s641_s9 }
  0x24   :  { %p648_p4 = por %p647_p3, %p646_p2 }
  0x26   :  { %p649_p5 = pnand %p648_p4, %p642_p1 }
  0x28   :  { %652 = shalt.err (!%p649_p5)  }
  0x29   :  { %s682_s2 = smov [#allocation6]  }
  0x2a   :  { %25 = dma.vmem_to_smem %s23_s6, 16, %s682_s2, [#allocation2] }
  0x2b   :  { %665 = dma.done.wait [#allocation2], 64 }
  0x2c   :  { %666 = vsyncadd [#allocation2], 4294967232 }
  0x2d   :  { %27 = sfence }
  0x2e   :  { %s725_s3 = smov 0   ;;  %s727_s10 = smov 0  }
  0x2f   :  { %s729_s11 = smov 0  }
  0x30 LB: > { %s45_s12 = sadd.s32 1, %s673_s10  ;;  %p549_p6 = scmp.ge.s32.totalorder %s677_s11, 1  ;;  %s677_s11 = sphi %s729_s11, %s33_s11   ;;  %s673_s10 = sphi %s727_s10, %s1133_s10   ;;  %s669_s3 = sphi %s725_s3, %s1132_s3  }
  0x31   : > { %p47_p7 = scmp.ge.s32.totalorder %s45_s12, 4  ;;  %p132_p8 = scmp.lt.s32.totalorder %s677_s11, 5 }
  0x33   : > { %s1135_s12 = smov (%p47_p7, %s45_s12), 0  ;;  %p133_p9 = pnand %p549_p6, %p132_p8 }
  0x34   : > { %s550_s13 = sshll.u32 (!%p133_p9), %s669_s3, 1  ;;  %s743_s14 = sshll.u32 (!%p133_p9), %s669_s3, 2 }
  0x35   : > { %136 = sbr.rel (%p133_p9) target bundleno = 185 (0xb9), region = 24  ;;  %s206_s15 = sld [smem:[#allocation3 + %s743_s14]] (!%p133_p9) }
  0x36   : > { %s207_s16 = sld [smem:[#allocation4 + %s743_s14]] (!%p133_p9)  ;;  %s232_s17 = sadd.s32 (!%p133_p9), 1, %s743_s14 }
  0x37   : > { %p164_p10 = scmp.lt.s32.totalorder (!%p133_p9), %s550_s13, 7  ;;  %s233_s18 = sld [smem:[#allocation3 + %s232_s17]] (!%p133_p9) }
  0x38   : > { %s234_s19 = sld [smem:[#allocation4 + %s232_s17]] (!%p133_p9)  ;;  %s840_s30 = sadd.s32 (!%p133_p9), 2, %s743_s14 }
  0x39   : > { %s757_s20 = sld [smem:[#allocation5 + %s743_s14]] (!%p133_p9)  ;;  %s868_s9 = sadd.s32 (!%p133_p9), 1, %s840_s30 }
  0x3a   : > { %v187_v0 = vlaneseq  ;;  %s1137_s13 = smov (!%p164_p10, %s550_s13), 7  ;;  %s267_s22 = sld [smem:[#allocation6 + %s743_s14]] }
  0x3b   : > { %v761_v4 = vstv %s206_s15  ;;  %s770_s23 = sld [smem:[#allocation5 + %s232_s17]]  ;;  %s576_s26 = smul.u32 56, %s1137_s13 }
  0x3c   : > { %v746_v1 = vshrl.u32 %v187_v0, 7  ;;  %s216_s21 = sadd.s32 %s207_s16, %s206_s15  ;;  %v766_v5 = vand.u32 127, %v187_v0  ;;  %s275_s24 = sld [smem:[#allocation6 + %s232_s17]] }
  0x3d   : > { %v768_v6 = vstv %s216_s21  ;;  %v778_v7 = vstv %s233_s18  ;;  %s825_s28 = scalar_lea.vmem %s1109_s4, %s576_s26  ;;  %s849_s8 = scalar_lea.vmem %s1110_s5, %s576_s26 }
  0x3e   : > { %v751_v2 = vadd.s32 8, %v746_v1  ;;  %v754_v3 = vadd.s32 16, %v746_v1  ;;  %vm209_vm0 = vcmp.ge.s32.totalorder %v746_v1, %v761_v4  ;;  %vm218_vm3 = vcmp.lt.s32.totalorder %v746_v1, %v768_v6  ;;  %s243_s25 = sadd.s32 %s234_s19, %s233_s18  ;;  %v306_v18 = vld [vmem:[%s825_s28] sm:$0xff]  ;;  %v307_v21 = vld [vmem:[%s825_s28 + $0x8] sm:$0xff]  ;;  %s873_s2 = sld [smem:[#allocation3 + %s840_s30]] }
  0x3f   : > { %vm784_vm6 = vmand %vm209_vm0, %vm218_vm3  ;;  %vm236_vm7 = vcmp.ge.s32.totalorder %v746_v1, %v778_v7  ;;  %v791_v9 = vstv %s243_s25  ;;  %v268_v10 = vstv %s757_s20  ;;  %v844_v19 = vadd.s32 24, %v746_v1  ;;  %s886_s3 = sld [smem:[#allocation4 + %s840_s30]] }
  0x40   : > { %vm210_vm1 = vcmp.ge.s32.totalorder %v751_v2, %v761_v4  ;;  %vm211_vm2 = vcmp.ge.s32.totalorder %v754_v3, %v761_v4  ;;  %vm219_vm4 = vcmp.lt.s32.totalorder %v751_v2, %v768_v6  ;;  %vm220_vm5 = vcmp.lt.s32.totalorder %v754_v3, %v768_v6  ;;  %s270_s0 = sadd.s32 %s267_s22, %s757_s20  ;;  %s897_s13 = sld [smem:[#allocation3 + %s868_s9]] }
  0x41   : > { %vm794_vm8 = vmand %vm210_vm1, %vm219_vm4  ;;  %vm245_vm9 = vcmp.lt.s32.totalorder %v746_v1, %v791_v9  ;;  %vm237_vm10 = vcmp.ge.s32.totalorder %v751_v2, %v778_v7  ;;  %vm246_vm11 = vcmp.lt.s32.totalorder %v751_v2, %v791_v9  ;;  %vm269_vm14 = vcmp.ge.s32.totalorder %v766_v5, %v268_v10  ;;  %s902_s14 = sld [smem:[#allocation4 + %s868_s9]] }
  0x42   : > { %vm807_vm12 = vmand %vm211_vm2, %vm220_vm5  ;;  %v271_v14 = vstv %s270_s0  ;;  %v276_v15 = vstv %s770_s23  ;;  %s278_s29 = sadd.s32 %s275_s24, %s770_s23  ;;  %v883_v25 = vadd.s32 32, %v746_v1  ;;  %s905_s15 = sld [smem:[#allocation5 + %s840_s30]]  ;;  %v915_v28 = vadd.s32 40, %v746_v1 }
  0x43   : > { %vm811_vm13 = vmand %vm236_vm7, %vm245_vm9  ;;  %vm272_vm0 = vcmp.lt.s32.totalorder %v766_v5, %v271_v14  ;;  %vm277_vm1 = vcmp.ge.s32.totalorder %v766_v5, %v276_v15  ;;  %v279_v17 = vstv %s278_s29  ;;  %s918_s16 = sld [smem:[#allocation6 + %s840_s30]]  ;;  %v940_v31 = vadd.s32 48, %v746_v1 }
  0x44   : > { %vm259_vm15 = vmor %vm784_vm6, %vm811_vm13  ;;  %vm280_vm4 = vcmp.lt.s32.totalorder %v766_v5, %v279_v17  ;;  %vm212_vm6 = vcmp.ge.s32.totalorder %v844_v19, %v761_v4  ;;  %vm221_vm13 = vcmp.lt.s32.totalorder %v844_v19, %v768_v6  ;;  %s925_s17 = sld [smem:[#allocation5 + %s868_s9]]  ;;  %v964_v34 = vstv %s873_s2 }
  0x45   : > { %vm830_vm2 = vmand %vm237_vm10, %vm246_vm11  ;;  %vm238_vm10 = vcmp.ge.s32.totalorder %v754_v3, %v778_v7  ;;  %vm247_vm11 = vcmp.lt.s32.totalorder %v754_v3, %v791_v9  ;;  %s930_s18 = sld [smem:[#allocation6 + %s868_s9]]  ;;  %s342_s19 = sadd.s32 %s886_s3, %s873_s2 }
  0x46   : > { %vm273_vm3 = vmand %vm269_vm14, %vm272_vm0  ;;  %v966_v35 = vstv %s342_s19  ;;  %v973_v36 = vstv %s897_s13 }
  0x47   : > { %vm260_vm5 = vmor %vm794_vm8, %vm830_vm2  ;;  %vm320_vm8 = vcmask 654336   ;;  %vm239_vm2 = vcmp.ge.s32.totalorder %v844_v19, %v778_v7  ;;  %s369_s20 = sadd.s32 %s902_s14, %s897_s13 }
  0x48   : > { %vm281_vm7 = vmand %vm277_vm1, %vm280_vm4  ;;  %v975_v37 = vstv %s369_s20  ;;  %v394_v41 = vstv %s905_s15 }
  0x49   : > { %vm851_vm9 = vmor %vm273_vm3, %vm281_vm7  ;;  %vm248_vm3 = vcmp.lt.s32.totalorder %v844_v19, %v791_v9  ;;  %vm213_vm7 = vcmp.ge.s32.totalorder %v883_v25, %v761_v4  ;;  %s396_s21 = sadd.s32 %s918_s16, %s905_s15 }
  0x4a   : > { %vm299_vm14 = vmor %vm259_vm15, %vm851_vm9  ;;  %v397_v42 = vstv %s396_s21  ;;  %v402_v43 = vstv %s925_s17 }
  0x4b   : > { %v313_v22 = vsel %vm299_vm14, 0.0, %v306_v18  ;;  %vm300_vm0 = vmor %vm260_vm5, %vm851_vm9  ;;  %vm240_vm14 = vcmp.ge.s32.totalorder %v883_v25, %v778_v7  ;;  %s404_s22 = sadd.s32 %s930_s18, %s925_s17 }
  0x4c   : > { %321 = vst.msk [vmem:[%s849_s8] sm:$0xff] %vm320_vm8, %v313_v22  ;;  %v314_v23 = vsel %vm300_vm0, 0.0, %v307_v21  ;;  %vm254_vm1 = vmand %vm238_vm10, %vm247_vm11  ;;  %vm222_vm10 = vcmp.lt.s32.totalorder %v883_v25, %v768_v6  ;;  %vm249_vm0 = vcmp.lt.s32.totalorder %v883_v25, %v791_v9  ;;  %v405_v44 = vstv %s404_s22 }
  0x4d   : > { %vm261_vm15 = vmor %vm807_vm12, %vm254_vm1 }
  0x4e   : > { %vm301_vm4 = vmor %vm261_vm15, %vm851_vm9  ;;  %vm214_vm15 = vcmp.ge.s32.totalorder %v915_v28, %v761_v4 }
  0x4f   : > { %vm228_vm5 = vmand %vm212_vm6, %vm221_vm13 }
  0x50   : > { %vm255_vm12 = vmand %vm239_vm2, %vm248_vm3  ;;  %vm223_vm2 = vcmp.lt.s32.totalorder %v915_v28, %v768_v6 }
  0x51   : > { %vm262_vm11 = vmor %vm228_vm5, %vm255_vm12  ;;  %vm250_vm5 = vcmp.lt.s32.totalorder %v915_v28, %v791_v9 }
  0x52   : > { %vm302_vm1 = vmor %vm262_vm11, %vm851_vm9  ;;  %vm215_vm11 = vcmp.ge.s32.totalorder %v940_v31, %v761_v4 }
  0x53   : > { %v308_v24 = vld [vmem:[%s825_s28 + $0x10] sm:$0xff]  ;;  %vm229_vm6 = vmand %vm213_vm7, %vm222_vm10 }
  0x54   : > { %322 = vst.msk [vmem:[%s849_s8 + $0x8] sm:$0xff] %vm320_vm8, %v314_v23  ;;  %v315_v26 = vsel %vm301_vm4, 0.0, %v308_v24  ;;  %vm256_vm13 = vmand %vm240_vm14, %vm249_vm0  ;;  %vm241_vm4 = vcmp.ge.s32.totalorder %v915_v28, %v778_v7  ;;  %vm224_vm14 = vcmp.lt.s32.totalorder %v940_v31, %v768_v6 }
  0x55   : > { %323 = vst.msk [vmem:[%s849_s8 + $0x10] sm:$0xff] %vm320_vm8, %v315_v26  ;;  %vm263_vm3 = vmor %vm229_vm6, %vm256_vm13  ;;  %vm251_vm6 = vcmp.lt.s32.totalorder %v940_v31, %v791_v9 }
  0x56   : > { %vm303_vm12 = vmor %vm263_vm3, %vm851_vm9 }
  0x57   : > { %vm230_vm7 = vmand %vm214_vm15, %vm223_vm2  ;;  %vm327_vm2 = vcmask 648192  }
  0x58   : > { %vm257_vm10 = vmand %vm241_vm4, %vm250_vm5  ;;  %vm335_vm4 = vcmp.ge.s32.totalorder %v746_v1, %v964_v34  ;;  %vm344_vm5 = vcmp.lt.s32.totalorder %v746_v1, %v966_v35 }
  0x59   : > { %vm264_vm0 = vmor %vm230_vm7, %vm257_vm10  ;;  %vm362_vm7 = vcmp.ge.s32.totalorder %v746_v1, %v973_v36  ;;  %vm371_vm10 = vcmp.lt.s32.totalorder %v746_v1, %v975_v37 }
  0x5a   : > { %vm304_vm13 = vmor %vm264_vm0, %vm851_vm9  ;;  %vm395_vm0 = vcmp.ge.s32.totalorder %v766_v5, %v394_v41 }
  0x5b   : > { %vm979_vm15 = vmand %vm215_vm11, %vm224_vm14 }
  0x5c   : > { %v309_v27 = vld [vmem:[%s825_s28 + $0x18] sm:$0xff]  ;;  %vm1000_vm14 = vmand %vm335_vm4, %vm344_vm5  ;;  %vm336_vm5 = vcmp.ge.s32.totalorder %v751_v2, %v964_v34 }
  0x5d   : > { %v316_v29 = vsel %vm302_vm1, 0.0, %v309_v27  ;;  %vm242_vm1 = vcmp.ge.s32.totalorder %v940_v31, %v778_v7 }
  0x5e   : > { %324 = vst.msk [vmem:[%s849_s8 + $0x18] sm:$0xff] %vm320_vm8, %v316_v29  ;;  %vm258_vm3 = vmand %vm242_vm1, %vm251_vm6  ;;  %vm398_vm1 = vcmp.lt.s32.totalorder %v766_v5, %v397_v42 }
  0x5f   : > { %vm378_vm6 = vmand %vm362_vm7, %vm371_vm10  ;;  %vm363_vm7 = vcmp.ge.s32.totalorder %v751_v2, %v973_v36  ;;  %vm372_vm10 = vcmp.lt.s32.totalorder %v751_v2, %v975_v37 }
  0x65   : > { %v310_v30 = vld [vmem:[%s825_s28 + $0x20] sm:$0xff] }
  0x66   : > { %v317_v32 = vsel %vm303_vm12, 0.0, %v310_v30  ;;  %vm265_vm12 = vmor %vm979_vm15, %vm258_vm3  ;;  %vm406_vm15 = vcmp.lt.s32.totalorder %v766_v5, %v405_v44 }
  0x67   : > { %325 = vst.msk [vmem:[%s849_s8 + $0x20] sm:$0xff] %vm320_vm8, %v317_v32  ;;  %vm305_vm11 = vmor %vm265_vm12, %vm851_vm9  ;;  %vm345_vm12 = vcmp.lt.s32.totalorder %v751_v2, %v966_v35 }
  0x68   : > { %vm385_vm9 = vmor %vm1000_vm14, %vm378_vm6  ;;  %vm337_vm6 = vcmp.ge.s32.totalorder %v754_v3, %v964_v34 }
  0x69   : > { %vm399_vm3 = vmand %vm395_vm0, %vm398_vm1 }
  0x6a   : > { %vm352_vm0 = vmand %vm336_vm5, %vm345_vm12 }
  0x6b   : > { %vm379_vm1 = vmand %vm363_vm7, %vm372_vm10  ;;  %vm338_vm7 = vcmp.ge.s32.totalorder %v844_v19, %v964_v34  ;;  %vm347_vm10 = vcmp.lt.s32.totalorder %v844_v19, %v966_v35 }
  0x6e   : > { %v311_v33 = vld [vmem:[%s825_s28 + $0x28] sm:$0xff] }
  0x6f   : > { %v318_v38 = vsel %vm304_vm13, 0.0, %v311_v33  ;;  %vm403_vm13 = vcmp.ge.s32.totalorder %v766_v5, %v402_v43 }
  0x70   : > { %326 = vst.msk [vmem:[%s849_s8 + $0x28] sm:$0xff] %vm320_vm8, %v318_v38  ;;  %vm407_vm4 = vmand %vm403_vm13, %vm406_vm15  ;;  %vm346_vm13 = vcmp.lt.s32.totalorder %v754_v3, %v966_v35 }
  0x71   : > { %vm386_vm15 = vmor %vm352_vm0, %vm379_vm1  ;;  %vm365_vm0 = vcmp.ge.s32.totalorder %v844_v19, %v973_v36  ;;  %vm374_vm1 = vcmp.lt.s32.totalorder %v844_v19, %v975_v37 }
  0x72   : > { %vm353_vm5 = vmand %vm337_vm6, %vm346_vm13 }
  0x73   : > { %vm354_vm13 = vmand %vm338_vm7, %vm347_vm10 }
  0x77   : > { %v312_v40 = vld [vmem:[%s825_s28 + $0x30] sm:$0x3] }
  0x78   : > { %v319_v45 = vsel %vm305_vm11, 0.0, %v312_v40  ;;  %vm1017_vm11 = vmor %vm399_vm3, %vm407_vm4  ;;  %vm364_vm3 = vcmp.ge.s32.totalorder %v754_v3, %v973_v36 }
  0x79   : > { %328 = vst.msk [vmem:[%s849_s8 + $0x30] sm:$0x3] %vm327_vm2, %v319_v45  ;;  %vm425_vm14 = vmor %vm385_vm9, %vm1017_vm11  ;;  %vm373_vm9 = vcmp.lt.s32.totalorder %v754_v3, %v975_v37 }
  0x7a   : > { %vm426_vm4 = vmor %vm386_vm15, %vm1017_vm11 }
  0x7b   : > { %vm380_vm12 = vmand %vm364_vm3, %vm373_vm9  ;;  %vm339_vm3 = vcmp.ge.s32.totalorder %v883_v25, %v964_v34  ;;  %vm348_vm9 = vcmp.lt.s32.totalorder %v883_v25, %v966_v35 }
  0x7c   : > { %vm381_vm15 = vmand %vm365_vm0, %vm374_vm1  ;;  %vm340_vm0 = vcmp.ge.s32.totalorder %v915_v28, %v964_v34  ;;  %vm349_vm1 = vcmp.lt.s32.totalorder %v915_v28, %v966_v35 }
  0x7d   : > { %vm355_vm10 = vmand %vm339_vm3, %vm348_vm9 }
  0x7e   : > { %vm356_vm9 = vmand %vm340_vm0, %vm349_vm1 }
  0x80   : > { %v557_v47 = vld [vmem:[%s825_s28 + $0x38] sm:$0xff] }
  0x81   : > { %v440_v49 = vsel %vm425_vm14, 0.0, %v557_v47  ;;  %vm387_vm14 = vmor %vm353_vm5, %vm380_vm12  ;;  %vm366_vm5 = vcmp.ge.s32.totalorder %v883_v25, %v973_v36  ;;  %vm375_vm12 = vcmp.lt.s32.totalorder %v883_v25, %v975_v37 }
  0x82   : > { %564 = vst.msk [vmem:[%s849_s8 + $0x38] sm:$0xff] %vm320_vm8, %v440_v49  ;;  %vm427_vm6 = vmor %vm387_vm14, %vm1017_vm11 }
  0x83   : > { %vm382_vm14 = vmand %vm366_vm5, %vm375_vm12  ;;  %vm341_vm5 = vcmp.ge.s32.totalorder %v940_v31, %v964_v34  ;;  %vm350_vm12 = vcmp.lt.s32.totalorder %v940_v31, %v966_v35 }
  0x84   : > { %vm357_vm1 = vmand %vm341_vm5, %vm350_vm12 }
  0x89   : > { %v558_v50 = vld [vmem:[%s825_s28 + $0x40] sm:$0xff] }
  0x8a   : > { %v441_v51 = vsel %vm426_vm4, 0.0, %v558_v50  ;;  %vm388_vm4 = vmor %vm354_vm13, %vm381_vm15  ;;  %vm367_vm13 = vcmp.ge.s32.totalorder %v915_v28, %v973_v36  ;;  %vm376_vm15 = vcmp.lt.s32.totalorder %v915_v28, %v975_v37 }
  0x8b   : > { %565 = vst.msk [vmem:[%s849_s8 + $0x40] sm:$0xff] %vm320_vm8, %v441_v51  ;;  %vm428_vm7 = vmor %vm388_vm4, %vm1017_vm11 }
  0x8c   : > { %vm383_vm4 = vmand %vm367_vm13, %vm376_vm15 }
  0x92   : > { %v559_v52 = vld [vmem:[%s825_s28 + $0x48] sm:$0xff] }
  0x93   : > { %v442_v53 = vsel %vm427_vm6, 0.0, %v559_v52  ;;  %vm389_vm6 = vmor %vm355_vm10, %vm382_vm14  ;;  %vm368_vm10 = vcmp.ge.s32.totalorder %v940_v31, %v973_v36  ;;  %vm377_vm14 = vcmp.lt.s32.totalorder %v940_v31, %v975_v37 }
  0x94   : > { %566 = vst.msk [vmem:[%s849_s8 + $0x48] sm:$0xff] %vm320_vm8, %v442_v53  ;;  %vm429_vm3 = vmor %vm389_vm6, %vm1017_vm11 }
  0x95   : > { %vm384_vm6 = vmand %vm368_vm10, %vm377_vm14 }
  0x96   : > { %vm391_vm13 = vmor %vm357_vm1, %vm384_vm6 }
  0x97   : > { %vm431_vm15 = vmor %vm391_vm13, %vm1017_vm11 }
  0x9b   : > { %v560_v54 = vld [vmem:[%s825_s28 + $0x50] sm:$0xff] }
  0x9c   : > { %v443_v55 = vsel %vm428_vm7, 0.0, %v560_v54  ;;  %vm390_vm7 = vmor %vm356_vm9, %vm383_vm4 }
  0x9d   : > { %567 = vst.msk [vmem:[%s849_s8 + $0x50] sm:$0xff] %vm320_vm8, %v443_v55  ;;  %vm430_vm0 = vmor %vm390_vm7, %vm1017_vm11 }
  0xa4   : > { %v561_v56 = vld [vmem:[%s825_s28 + $0x58] sm:$0xff] }
  0xa5   : > { %v444_v57 = vsel %vm429_vm3, 0.0, %v561_v56 }
  0xa6   : > { %568 = vst.msk [vmem:[%s849_s8 + $0x58] sm:$0xff] %vm320_vm8, %v444_v57 }
  0xad   : > { %v562_v58 = vld [vmem:[%s825_s28 + $0x60] sm:$0xff] }
  0xae   : > { %v445_v59 = vsel %vm430_vm0, 0.0, %v562_v58 }
  0xaf   : > { %569 = vst.msk [vmem:[%s849_s8 + $0x60] sm:$0xff] %vm320_vm8, %v445_v59 }
  0xb6   : > { %v563_v60 = vld [vmem:[%s825_s28 + $0x68] sm:$0x3] }
  0xb7   : > { %v446_v61 = vsel %vm431_vm15, 0.0, %v563_v60 }
  0xb8   : > { %570 = vst.msk [vmem:[%s849_s8 + $0x68] sm:$0x3] %vm327_vm2, %v446_v61 }
  0xb9 PF: > { %s33_s11 = sadd.s32 1, %s677_s11   ;;  %s1132_s3 = smov %s673_s10 }
  0xba   : > { %p30_p11 = scmp.ge.s32.totalorder %s33_s11, 6   ;;  %s1133_s10 = smov %s1135_s12 }
  0xbc   :  { %32 = sbr.rel (!%p30_p11) target bundleno = 48 (0x30), region = 56 }

</bundles_post_ra>
